<compile_context>
chip_gen: v5e
topology: v5e:2x2
jax: 0.10.0
libtpu: 0.0.40
codegen_flags: <defaults>
</compile_context>

<pallas_src>
import jax
import jax.numpy as jnp
from jax.experimental import pallas as pl
from jax.experimental.pallas import tpu as pltpu

# ---------------- synthetic cfg (deterministic, small) ----------------
FEA_SIZE = 32      # cfg.fea_size
H_SIZE   = 32      # cfg.h_size
N_LAYERS = 2       # cfg.layers
N_NODES  = 128     # number of graph nodes
DROP     = 0.0     # cfg.drop_rate -- eval mode, dropout is identity
# cfg.agg_type = "mean", cfg.act = relu
# TODO(synk): training-mode feat_drop (dropout) not implemented; eval semantics only.


def fused_sage_kernel(aT_ref, invdeg_ref, h0T_ref, wsT_ref, wnT_ref, bT_ref, oT_ref):
    """All SAGEConv layers fused; [F, N] activation layout, everything resident in VMEM.

    aT_ref    : [N, N]     bf16 EXACT binary adjacency, transposed (A^T), reused by all layers
    invdeg_ref: [1, N]     f32  1/degree per node (lane-wise scale for the mean)
    h0T_ref   : [F, N]     bf16 input node features, transposed (feature dim zero-padded to F)
    wsT_ref   : [L, F, F]  bf16 per-layer W_self^T  (padded to F x F)
    wnT_ref   : [L, F, F]  bf16 per-layer W_neigh^T (padded to F x F)
    bT_ref    : [L, F, 1]  f32  per-layer bias (column vector)
    oT_ref    : [F, N]     f32  output of the final layer, transposed (lane-dense store)
    """
    aT = aT_ref[...]                                  # bf16 0/1, exact
    inv_deg = invdeg_ref[...]                         # f32 [1, N]
    hT = None                                         # f32 carried activation (layers > 0)
    for l in range(N_LAYERS):                         # static unroll (L is small, static)
        # layer-0 operand is already bf16; later layers cast the f32 activation once
        hT_bf = h0T_ref[...] if l == 0 else hT.astype(jnp.bfloat16)
        # mean aggregation: unnormalized neighbor sum on the MXU (exact binary A),
        # then exact f32 degree scale on the VPU (lane-wise multiply)
        neighT = jnp.dot(hT_bf, aT, preferred_element_type=jnp.float32) * inv_deg
        # two accumulating MXU matmuls (no lane-axis concatenate): N=128 output columns
        out = (jnp.dot(wsT_ref[l], hT_bf, preferred_element_type=jnp.float32)
               + jnp.dot(wnT_ref[l], neighT.astype(jnp.bfloat16),
                         preferred_element_type=jnp.float32))
        # f32 epilogue on the VPU: bias add + ReLU (cfg.act)
        hT = jnp.maximum(out + bT_ref[l], 0.0)
    oT_ref[...] = hT.astype(oT_ref.dtype)             # [32, 128] f32 -> lane-dense store


@jax.jit
def gnn_forward(aT_bin, inv_deg, featT, wsT, wnT, bT):
    """Equivalent of GNN.forward(g, features) with calc_mad=False: returns (h, outputs)."""
    f, n = featT.shape
    hT = pl.pallas_call(
        fused_sage_kernel,
        out_shape=jax.ShapeDtypeStruct((f, n), jnp.float32),
        in_specs=[pl.BlockSpec(memory_space=pltpu.MemorySpace.VMEM)] * 6,
        out_specs=pl.BlockSpec(memory_space=pltpu.MemorySpace.VMEM),
        compiler_params=pltpu.CompilerParams(vmem_limit_bytes=32 * 1024 * 1024),
    )(aT_bin, inv_deg, featT, wsT, wnT, bT)
    # transpose back to the module's [N, F] orientation (wrapper-side layout plumbing)
    # TODO(synk): calc_mad=True (per-layer output collection) not emitted by the fused kernel.
    return hT.T, []


def init_params(key):
    """Deterministic Xavier-uniform-ish init; returns raw f32 params + transposed MXU operands."""
    f = H_SIZE
    dims = [(FEA_SIZE, H_SIZE)] + [(H_SIZE, H_SIZE)] * (N_LAYERS - 1)
    raw, wsT_l, wnT_l, bT_l = [], [], [], []
    for (fin, fout) in dims:
        k1, k2, k3, key = jax.random.split(key, 4)
        limit = (6.0 / (fin + fout)) ** 0.5
        w_self = jax.random.uniform(k1, (fin, fout), jnp.float32, -limit, limit)
        w_neigh = jax.random.uniform(k2, (fin, fout), jnp.float32, -limit, limit)
        bias = jax.random.uniform(k3, (fout,), jnp.float32, -0.1, 0.1)
        raw.append((w_self, w_neigh, bias))
        # transpose for the [F, N] layout and zero-pad to [F, F]
        wsT_l.append(jnp.pad(w_self.T, ((0, f - fout), (0, f - fin))))
        wnT_l.append(jnp.pad(w_neigh.T, ((0, f - fout), (0, f - fin))))
        bT_l.append(jnp.pad(bias, (0, f - fout)).reshape(-1, 1))
    return (raw,
            jnp.stack(wsT_l).astype(jnp.bfloat16),
            jnp.stack(wnT_l).astype(jnp.bfloat16),
            jnp.stack(bT_l).astype(jnp.float32))


def build_graph(key, n_nodes):
    """Deterministic random graph -> exact binary adjacency + degrees."""
    adj = jax.random.bernoulli(key, p=0.05, shape=(n_nodes, n_nodes)).astype(jnp.float32)
    adj = jnp.maximum(adj, jnp.eye(n_nodes, dtype=jnp.float32))   # self-loops, no zero rows
    deg = jnp.sum(adj, axis=1)
    return adj, deg


if __name__ == "__main__":
    key = jax.random.PRNGKey(0)
    k_graph, k_feat, k_param = jax.random.split(key, 3)

    a_bin, deg = build_graph(k_graph, N_NODES)                    # [128,128] 0/1, [128]
    a_norm = a_bin / deg[:, None]                                 # reference-only
    inv_deg = (1.0 / deg).reshape(1, -1).astype(jnp.float32)      # [1, 128] f32

    features = jax.random.normal(k_feat, (N_NODES, FEA_SIZE),     # [128, 32]
                                 dtype=jnp.float32)
    feat_pad = jnp.pad(features, ((0, 0), (0, H_SIZE - FEA_SIZE)))  # no-op here
    featT = feat_pad.T.astype(jnp.bfloat16)                       # [32, 128] bf16

    raw_params, wsT, wnT, bT = init_params(k_param)               # [2,32,32]x2, [2,32,1]
    aT_bf = a_bin.T.astype(jnp.bfloat16)                          # exact 0/1 in bf16

    h, outputs = gnn_forward(aT_bf, inv_deg, featT, wsT, wnT, bT)
    h = jax.block_until_ready(h)

    # Reference 1: exact f32 math of the PyTorch module (loose tol: kernel feeds MXU bf16).
    href = features
    for (ws, wn, b) in raw_params:
        href = jnp.maximum(href @ ws + (a_norm @ href) @ wn + b, 0.0)

    # Reference 2: mimics the kernel's transposed bf16-input / f32-accumulate arithmetic.
    cur = None
    for l in range(N_LAYERS):
        hb = featT if l == 0 else cur.astype(jnp.bfloat16)
        neighT = jnp.dot(hb, aT_bf, preferred_element_type=jnp.float32) * inv_deg
        out = (jnp.dot(wsT[l], hb, preferred_element_type=jnp.float32)
               + jnp.dot(wnT[l], neighT.astype(jnp.bfloat16),
                         preferred_element_type=jnp.float32))
        cur = jnp.maximum(out + bT[l], 0.0)
    hm = cur.T

    assert h.shape == (N_NODES, H_SIZE)
    assert jnp.allclose(h, hm, atol=1e-2, rtol=1e-2), "mismatch vs bf16-mimic reference"
    assert jnp.allclose(h, href, atol=1e-1, rtol=1e-1), "mismatch vs f32 reference"
    print("KERNEL_OK")
</pallas_src>

<mosaic_0001>
module attributes {stable_mosaic.version = 11 : i64} {
  func.func @fused_sage_kernel(%arg0: memref<128x128xbf16, #tpu.memory_space<vmem>>, %arg1: memref<1x128xf32, #tpu.memory_space<vmem>>, %arg2: memref<32x128xbf16, #tpu.memory_space<vmem>>, %arg3: memref<2x32x32xbf16, #tpu.memory_space<vmem>>, %arg4: memref<2x32x32xbf16, #tpu.memory_space<vmem>>, %arg5: memref<2x32x1xf32, #tpu.memory_space<vmem>>, %arg6: memref<32x128xf32, #tpu.memory_space<vmem>>) attributes {dimension_semantics = [], scalar_prefetch = 0 : i64, scratch_operands = 0 : i64, tpu.core_type = #tpu.core_type<tc>} {
    %c0 = arith.constant 0 : index
    %c0_0 = arith.constant 0 : index
    %0 = vector.load %arg0[%c0, %c0_0] : memref<128x128xbf16, #tpu.memory_space<vmem>>, vector<128x128xbf16>
    %c0_1 = arith.constant 0 : index
    %c0_2 = arith.constant 0 : index
    %1 = vector.load %arg1[%c0_1, %c0_2] : memref<1x128xf32, #tpu.memory_space<vmem>>, vector<1x128xf32>
    %c0_3 = arith.constant 0 : index
    %c0_4 = arith.constant 0 : index
    %2 = vector.load %arg2[%c0_3, %c0_4] : memref<32x128xbf16, #tpu.memory_space<vmem>>, vector<32x128xbf16>
    %cst = arith.constant dense<0.000000e+00> : vector<32x128xf32>
    %3 = tpu.matmul %2, %0, %cst {dimension_numbers = #tpu.dot_dimension_numbers<[1], [0], [0], [1], [0, 0, 1, 1], [], []>} : vector<32x128xbf16>, vector<128x128xbf16>, vector<32x128xf32> -> vector<32x128xf32>
    %4 = vector.broadcast %1 : vector<1x128xf32> to vector<32x128xf32>
    %5 = arith.mulf %3, %4 : vector<32x128xf32>
    %c0_5 = arith.constant 0 : index
    %c0_6 = arith.constant 0 : index
    %c0_7 = arith.constant 0 : index
    %6 = vector.load %arg3[%c0_5, %c0_6, %c0_7] : memref<2x32x32xbf16, #tpu.memory_space<vmem>>, vector<1x32x32xbf16>
    %7 = vector.shape_cast %6 : vector<1x32x32xbf16> to vector<32x32xbf16>
    %cst_8 = arith.constant dense<0.000000e+00> : vector<32x128xf32>
    %8 = tpu.matmul %7, %2, %cst_8 {dimension_numbers = #tpu.dot_dimension_numbers<[1], [0], [0], [1], [0, 0, 1, 1], [], []>} : vector<32x32xbf16>, vector<32x128xbf16>, vector<32x128xf32> -> vector<32x128xf32>
    %c0_9 = arith.constant 0 : index
    %c0_10 = arith.constant 0 : index
    %c0_11 = arith.constant 0 : index
    %9 = vector.load %arg4[%c0_9, %c0_10, %c0_11] : memref<2x32x32xbf16, #tpu.memory_space<vmem>>, vector<1x32x32xbf16>
    %10 = vector.shape_cast %9 : vector<1x32x32xbf16> to vector<32x32xbf16>
    %11 = arith.truncf %5 : vector<32x128xf32> to vector<32x128xbf16>
    %cst_12 = arith.constant dense<0.000000e+00> : vector<32x128xf32>
    %12 = tpu.matmul %10, %11, %cst_12 {dimension_numbers = #tpu.dot_dimension_numbers<[1], [0], [0], [1], [0, 0, 1, 1], [], []>} : vector<32x32xbf16>, vector<32x128xbf16>, vector<32x128xf32> -> vector<32x128xf32>
    %13 = arith.addf %8, %12 : vector<32x128xf32>
    %c0_13 = arith.constant 0 : index
    %c0_14 = arith.constant 0 : index
    %c0_15 = arith.constant 0 : index
    %14 = vector.load %arg5[%c0_13, %c0_14, %c0_15] : memref<2x32x1xf32, #tpu.memory_space<vmem>>, vector<1x32x1xf32>
    %15 = vector.shape_cast %14 : vector<1x32x1xf32> to vector<32x1xf32>
    %16 = vector.broadcast %15 : vector<32x1xf32> to vector<32x128xf32>
    %17 = arith.addf %13, %16 : vector<32x128xf32>
    %cst_16 = arith.constant 0.000000e+00 : f32
    %18 = vector.broadcast %cst_16 : f32 to vector<32x128xf32>
    %19 = arith.maximumf %17, %18 : vector<32x128xf32>
    %20 = arith.truncf %19 : vector<32x128xf32> to vector<32x128xbf16>
    %cst_17 = arith.constant dense<0.000000e+00> : vector<32x128xf32>
    %21 = tpu.matmul %20, %0, %cst_17 {dimension_numbers = #tpu.dot_dimension_numbers<[1], [0], [0], [1], [0, 0, 1, 1], [], []>} : vector<32x128xbf16>, vector<128x128xbf16>, vector<32x128xf32> -> vector<32x128xf32>
    %22 = vector.broadcast %1 : vector<1x128xf32> to vector<32x128xf32>
    %23 = arith.mulf %21, %22 : vector<32x128xf32>
    %c1 = arith.constant 1 : index
    %c0_18 = arith.constant 0 : index
    %c0_19 = arith.constant 0 : index
    %24 = vector.load %arg3[%c1, %c0_18, %c0_19] : memref<2x32x32xbf16, #tpu.memory_space<vmem>>, vector<1x32x32xbf16>
    %25 = vector.shape_cast %24 : vector<1x32x32xbf16> to vector<32x32xbf16>
    %cst_20 = arith.constant dense<0.000000e+00> : vector<32x128xf32>
    %26 = tpu.matmul %25, %20, %cst_20 {dimension_numbers = #tpu.dot_dimension_numbers<[1], [0], [0], [1], [0, 0, 1, 1], [], []>} : vector<32x32xbf16>, vector<32x128xbf16>, vector<32x128xf32> -> vector<32x128xf32>
    %c1_21 = arith.constant 1 : index
    %c0_22 = arith.constant 0 : index
    %c0_23 = arith.constant 0 : index
    %27 = vector.load %arg4[%c1_21, %c0_22, %c0_23] : memref<2x32x32xbf16, #tpu.memory_space<vmem>>, vector<1x32x32xbf16>
    %28 = vector.shape_cast %27 : vector<1x32x32xbf16> to vector<32x32xbf16>
    %29 = arith.truncf %23 : vector<32x128xf32> to vector<32x128xbf16>
    %cst_24 = arith.constant dense<0.000000e+00> : vector<32x128xf32>
    %30 = tpu.matmul %28, %29, %cst_24 {dimension_numbers = #tpu.dot_dimension_numbers<[1], [0], [0], [1], [0, 0, 1, 1], [], []>} : vector<32x32xbf16>, vector<32x128xbf16>, vector<32x128xf32> -> vector<32x128xf32>
    %31 = arith.addf %26, %30 : vector<32x128xf32>
    %c1_25 = arith.constant 1 : index
    %c0_26 = arith.constant 0 : index
    %c0_27 = arith.constant 0 : index
    %32 = vector.load %arg5[%c1_25, %c0_26, %c0_27] : memref<2x32x1xf32, #tpu.memory_space<vmem>>, vector<1x32x1xf32>
    %33 = vector.shape_cast %32 : vector<1x32x1xf32> to vector<32x1xf32>
    %34 = vector.broadcast %33 : vector<32x1xf32> to vector<32x128xf32>
    %35 = arith.addf %31, %34 : vector<32x128xf32>
    %cst_28 = arith.constant 0.000000e+00 : f32
    %36 = vector.broadcast %cst_28 : f32 to vector<32x128xf32>
    %37 = arith.maximumf %35, %36 : vector<32x128xf32>
    %c0_29 = arith.constant 0 : index
    %c0_30 = arith.constant 0 : index
    %38 = vector.load %arg6[%c0_29, %c0_30] : memref<32x128xf32, #tpu.memory_space<vmem>>, vector<32x128xf32>
    tpu.vector_store %arg6[%c0_29, %c0_30], %37 {strides = array<i32>} : memref<32x128xf32, #tpu.memory_space<vmem>>, vector<32x128xf32>,
    return
  }
}

</mosaic_0001>

<bundles_post_ra>
// kernel: gnn_forward.1
= control target key start
LH: loop header
LB: loop body
LE: loop exit
PB: predicated region body
PF: predicated region fallthrough
CT: control target
= control target key end

     0   :  { %11 = vsyncpa [#allocation3], 0  ;;  %s788_s0 = inlined_call_operand.vmem [shape: bf16[128,128], index: 0, kind: input, shape index: {}]   ;;  %s789_s1 = inlined_call_operand.vmem [shape: f32[1,128], index: 1, kind: input, shape index: {}]   ;;  %s790_s2 = inlined_call_operand.hbm [shape: bf16[32,128], index: 2, kind: input, shape index: {}]   ;;  %s791_s3 = inlined_call_operand.hbm [shape: bf16[2,32,32], index: 3, kind: input, shape index: {}]   ;;  %s792_s4 = inlined_call_operand.hbm [shape: bf16[2,32,32], index: 4, kind: input, shape index: {}]   ;;  %s793_s5 = inlined_call_operand.vmem [shape: f32[2,32,1], index: 5, kind: input, shape index: {}]   ;;  %s794_s6 = inlined_call_operand.hbm [shape: f32[32,128], index: 6, kind: output, shape index: {}]  }
   0x1   :  { %12 = vsyncpa [#allocation6], 0 }
   0x2   :  { %13 = vsyncpa [#allocation4], 0  ;;  %s35_s23 = sshll.u32 %s791_s3, 4  ;;  %s673_s24 = smov [#allocation5]   ;;  %s36_s23 = int_to_ptr.hbm [resolvable:$true] %s35_s23 }
   0x3   :  { %s37_s25 = sshll.u32 %s673_s24, 4  ;;  %s22_s28 = sshll.u32 %s790_s2, 4  ;;  %s38_s25 = int_to_ptr.vmem [resolvable:$true] %s37_s25  ;;  %s23_s28 = int_to_ptr.hbm [resolvable:$true] %s22_s28 }
   0x4   :  { %s674_s29 = smov 64   ;;  %s675_s30 = smov 4  }
   0x5   :  { %43 = dma.hbm_to_vmem [thread:$0]  %s36_s23, 512, %s38_s25, [#allocation6], %s674_s29, %s674_s29, %s675_s30  }
   0x6   :  { %s676_s7 = smov [#allocation2]   ;;  %s48_s11 = sshll.u32 %s792_s4, 4  ;;  %s49_s11 = int_to_ptr.hbm [resolvable:$true] %s48_s11 }
   0x7   :  { %s24_s8 = sshll.u32 %s676_s7, 4  ;;  %s677_s3 = smov [#allocation7]   ;;  %s25_s8 = int_to_ptr.vmem [resolvable:$true] %s24_s8 }
   0x8   :  { %30 = dma.hbm_to_vmem [thread:$0]  %s23_s28, 256, %s25_s8, [#allocation3], %s674_s29, %s674_s29, %s675_s30  }
   0x9   :  { %s50_s12 = sshll.u32 %s677_s3, 4  ;;  %s51_s12 = int_to_ptr.vmem [resolvable:$true] %s50_s12 }
   0xa   :  { %56 = dma.hbm_to_vmem [thread:$0]  %s49_s11, 512, %s51_s12, [#allocation6], %s674_s29, %s674_s29, %s675_s30  }
   0xb   :  { %667 = dma.done.wait [#allocation3], 256  }
   0xc   :  { %668 = vsyncadd [#allocation3], 4294967040 }
   0xd   :  { %669 = dma.done.wait [#allocation6], 1024  }
   0xe   :  { %670 = vsyncadd [#allocation6], 4294966272  ;;  %v547_v0 = vld [vmem:[%s788_s0 + $0x38] sm:$0xff]  ;;  %v546_v1 = vld [vmem:[%s788_s0 + $0x30] sm:$0xff]  ;;  %vm199_vm0 = vcmask 261120   ;;  %v678_v12 = vmov 0  }
   0xf   :  { %153 = vmatpush.bf16.msra.mxu0 %v547_v0  ;;  %294 = vmatpush.bf16.msra.mxu3 %v547_v0  ;;  %v549_v2 = vld [vmem:[#allocation2 + $0x8] sm:$0xff]  ;;  %v548_v4 = vld [vmem:[#allocation2] sm:$0xff]  ;;  %v543_v6 = vld [vmem:[%s788_s0 + $0x18] sm:$0xff]  ;;  %s442_s19 = sshll.u32 %s794_s6, 4  ;;  %s680_s20 = smov 128   ;;  %s443_s19 = int_to_ptr.hbm [resolvable:$true] %s442_s19 }
  0x10   :  { %247 = vmatpush.bf16.msra.mxu2 %v549_v2  ;;  %v545_v3 = vld [vmem:[%s788_s0 + $0x28] sm:$0xff]  ;;  %v544_v5 = vld [vmem:[%s788_s0 + $0x20] sm:$0xff]  ;;  %v542_v7 = vld [vmem:[%s788_s0 + $0x10] sm:$0xff]  ;;  %567 = vset.pattern.permute.xlu0 %v678_v12  ;;  %s681_s21 = smov 8  }
  0x11   :  { %v541_v8 = vld [vmem:[%s788_s0 + $0x8] sm:$0xff]  ;;  %v540_v9 = vld [vmem:[%s788_s0] sm:$0xff]  ;;  %v550_v10 = vld [vmem:[#allocation5] sm:$0xff]  ;;  %568 = vset.pattern.permute.xlu1 %v678_v12  ;;  %569 = vset.pattern.permute.xlu2 %v678_v12 }
  0x12   :  { %v260_v11 = vld [vmem:[%s793_s5] sm:$0xff]  ;;  %v551_v14 = vld [vmem:[#allocation5 + $0x8] sm:$0xff]  ;;  %v261_v15 = vld [vmem:[%s793_s5 + $0x8] sm:$0xff] }
  0x13   :  { %154 = vmatpush.bf16.msra.mxu0 %v546_v1  ;;  %295 = vmatpush.bf16.msra.mxu3 %v546_v1  ;;  %v262_v16 = vld [vmem:[%s793_s5 + $0x10] sm:$0xff]  ;;  %v263_v20 = vld [vmem:[%s793_s5 + $0x18] sm:$0xff]  ;;  %v570_v21 = vld [vmem:[%s789_s1] ss:$0 sm:$0xff] }
  0x14   :  { %248 = vmatpush.bf16.msra.mxu2 %v548_v4  ;;  %266 = vperm.xlu0 %567, %v260_v11   ;;  %v538_v18 = vld [vmem:[%s793_s5 + $0x30] sm:$0xff]  ;;  %v539_v25 = vld [vmem:[%s793_s5 + $0x38] sm:$0xff]  ;;  %v554_v58 = vld [vmem:[#allocation5 + $0x10] sm:$0xff] }
  0x15   :  { %276 = vperm.xlu1 %568, %v262_v16   ;;  %v552_v30 = vld [vmem:[#allocation7] sm:$0xff]  ;;  %v553_v31 = vld [vmem:[#allocation7 + $0x8] sm:$0xff]  ;;  %v555_v60 = vld [vmem:[#allocation5 + $0x18] sm:$0xff] }
  0x16   :  { %v536_v63 = vld [vmem:[%s793_s5 + $0x20] sm:$0xff] }
  0x17   :  { %155 = vmatpush.bf16.msra.mxu0 %v545_v3  ;;  %296 = vmatpush.bf16.msra.mxu3 %v545_v3  ;;  %v537_v3 = vld [vmem:[%s793_s5 + $0x28] sm:$0xff]  ;;  %s679_s5 = smov [#allocation8]  }
  0x18   :  { %514 = vmatmul.msk.bf16.vlgmr.msra.gmra.mxu2 %vm199_vm0, %v550_v10  ;;  %406 = vperm.xlu2 %569, %v536_v63   ;;  %s440_s16 = sshll.u32 %s679_s5, 4  ;;  %s441_s16 = int_to_ptr.vmem [resolvable:$true] %s440_s16 }
  0x1b   :  { %156 = vmatpush.bf16.msra.mxu0 %v544_v5  ;;  %297 = vmatpush.bf16.msra.mxu3 %v544_v5 }
  0x1c   :  { %271 = vperm.xlu0 %567, %v261_v15  }
  0x1d   :  { %281 = vperm.xlu1 %568, %v263_v20  }
  0x1f   :  { %157 = vmatpush.bf16.msra.mxu0 %v543_v6  ;;  %298 = vmatpush.bf16.msra.mxu3 %v543_v6 }
  0x20   :  { %411 = vperm.xlu2 %569, %v537_v3  }
  0x23   :  { %158 = vmatpush.bf16.msra.mxu0 %v542_v7  ;;  %299 = vmatpush.bf16.msra.mxu3 %v542_v7 }
  0x24   :  { %416 = vperm.xlu0 %567, %v538_v18  }
  0x25   :  { %421 = vperm.xlu1 %568, %v539_v25  }
  0x27   :  { %159 = vmatpush.bf16.msra.mxu0 %v541_v8  ;;  %300 = vmatpush.bf16.msra.mxu3 %v541_v8  ;;  %v556_v8 = vld [vmem:[#allocation7 + $0x10] sm:$0xff] }
  0x28   :  { %515 = vmatmul.msk.bf16.gmra.mxu2 %vm199_vm0, %v551_v14 }
  0x2b   :  { %160 = vmatpush.bf16.msra.mxu0 %v540_v9  ;;  %301 = vmatpush.bf16.msra.mxu3 %v540_v9  ;;  %v557_v9 = vld [vmem:[#allocation7 + $0x18] sm:$0xff] }
  0x2e   :  { %161 = vmatmul.bf16.vlgmr.msra.gmra.mxu0 %v548_v4 }
  0x3e   :  { %166 = vmatmul.bf16.gmra.mxu0 %v549_v2 }
  0x72   :  { %v407_v11 = vpop.permute.xlu2 %406 }
  0x7a   :  { %v412_v18 = vpop.permute.xlu2 %411 }
  0x86   :  { %v267_v33 = vpop.permute.xlu0 %266 }
  0x87   :  { %v277_v46 = vpop.permute.xlu1 %276 }
  0x8e   :  { %v272_v40 = vpop.permute.xlu0 %271 }
  0x8f   :  { %v282_v53 = vpop.permute.xlu1 %281 }
  0x96   :  { %v417_v25 = vpop.permute.xlu0 %416 }
  0x9b   :  { %v250_v32 = vpop.f32.mrf.mxu2 }
  0xa3   :  { %v252_v35 = vpop.f32.mrf.mxu2 }
  0xab   :  { %v162_v13 = vpop.f32.mrf.mxu0  ;;  %v255_v44 = vpop.f32.mrf.mxu2 }
  0xac   :  { %v175_v28 = vmul.f32 %v570_v21, %v162_v13 }
  0xb3   :  { %v164_v17 = vpop.f32.mrf.mxu0  ;;  %v257_v49 = vpop.f32.mrf.mxu2 }
  0xb4   :  { %v176_v26 = vmul.f32 %v570_v21, %v164_v17 }
  0xb6   :  { %v187_v29 = vpack.c.bf16 %v176_v26, %v175_v28 }
  0xbb   :  { %v167_v19 = vpop.f32.mrf.mxu0 }
  0xbc   :  { %v177_v23 = vmul.f32 %v570_v21, %v167_v19 }
  0xc3   :  { %v169_v22 = vpop.f32.mrf.mxu0 }
  0xc4   :  { %v178_v24 = vmul.f32 %v570_v21, %v169_v22 }
  0xc6   :  { %v188_v27 = vpack.c.bf16 %v178_v24, %v177_v23 }
  0xc8   :  { %212 = vmatpush.bf16.msra.mxu1 %v188_v27 }
  0xcc   :  { %213 = vmatpush.bf16.msra.mxu1 %v187_v29 }
  0xcf   :  { %504 = vmatmul.msk.bf16.vlgmr.msra.gmra.mxu1 %vm199_vm0, %v552_v30 }
  0xdf   :  { %505 = vmatmul.msk.bf16.gmra.mxu1 %vm199_vm0, %v553_v31  ;;  %v422_v31 = vpop.permute.xlu1 %421 }
 0x14c   :  { %v215_v34 = vpop.f32.mrf.mxu1 }
 0x14d   :  { %v251_v36 = vadd.f32 %v250_v32, %v215_v34 }
 0x14f   :  { %v284_v38 = vadd.f32 %v267_v33, %v251_v36 }
 0x151   :  { %v288_v42 = vmax.f32 %v284_v38, 0.0 }
 0x154   :  { %v217_v37 = vpop.f32.mrf.mxu1 }
 0x155   :  { %v253_v39 = vadd.f32 %v252_v35, %v217_v37 }
 0x157   :  { %v285_v41 = vadd.f32 %v272_v40, %v253_v39 }
 0x159   :  { %v289_v43 = vmax.f32 %v285_v41, 0.0 }
 0x15b   :  { %v292_v45 = vpack.c.bf16 %v289_v43, %v288_v42 }
 0x15c   :  { %v220_v47 = vpop.f32.mrf.mxu1 }
 0x15d   :  { %302 = vmatmul.bf16.vlgmr.msra.gmra.mxu3 %v292_v45  ;;  %v256_v48 = vadd.f32 %v255_v44, %v220_v47 }
 0x15f   :  { %v286_v51 = vadd.f32 %v277_v46, %v256_v48 }
 0x161   :  { %v290_v55 = vmax.f32 %v286_v51, 0.0 }
 0x164   :  { %v222_v50 = vpop.f32.mrf.mxu1 }
 0x165   :  { %v258_v52 = vadd.f32 %v257_v49, %v222_v50 }
 0x167   :  { %v287_v54 = vadd.f32 %v282_v53, %v258_v52 }
 0x169   :  { %v291_v56 = vmax.f32 %v287_v54, 0.0 }
 0x16b   :  { %v293_v57 = vpack.c.bf16 %v291_v56, %v290_v55 }
 0x16d   :  { %307 = vmatmul.bf16.gmra.mxu3 %v293_v57  ;;  %386 = vmatpush.bf16.msrb.mxu2 %v293_v57 }
 0x171   :  { %387 = vmatpush.bf16.msrb.mxu2 %v292_v45 }
 0x174   :  { %534 = vmatmul.msk.bf16.vlgmr.msrb.gmra.mxu2 %vm199_vm0, %v554_v58 }
 0x184   :  { %535 = vmatmul.msk.bf16.gmra.mxu2 %vm199_vm0, %v555_v60 }
 0x1e0   :  { %v303_v59 = vpop.f32.mrf.mxu3 }
 0x1e1   :  { %v313_v6 = vmul.f32 %v570_v21, %v303_v59 }
 0x1e8   :  { %v305_v61 = vpop.f32.mrf.mxu3 }
 0x1e9   :  { %v314_v4 = vmul.f32 %v570_v21, %v305_v61 }
 0x1eb   :  { %v327_v7 = vpack.c.bf16 %v314_v4, %v313_v6 }
 0x1f0   :  { %v308_v62 = vpop.f32.mrf.mxu3 }
 0x1f1   :  { %v315_v1 = vmul.f32 %v570_v21, %v308_v62 }
 0x1f7   :  { %v389_v10 = vpop.f32.mrf.mxu2 }
 0x1f8   :  { %v310_v0 = vpop.f32.mrf.mxu3 }
 0x1f9   :  { %v316_v2 = vmul.f32 %v570_v21, %v310_v0 }
 0x1fb   :  { %v328_v5 = vpack.c.bf16 %v316_v2, %v315_v1 }
 0x1fd   :  { %351 = vmatpush.bf16.msrb.mxu1 %v328_v5 }
 0x1ff   :  { %v391_v15 = vpop.f32.mrf.mxu2 }
 0x201   :  { %352 = vmatpush.bf16.msrb.mxu1 %v327_v7 }
 0x204   :  { %524 = vmatmul.msk.bf16.vlgmr.msrb.gmra.mxu1 %vm199_vm0, %v556_v8 }
 0x207   :  { %v394_v22 = vpop.f32.mrf.mxu2 }
 0x20f   :  { %v396_v29 = vpop.f32.mrf.mxu2 }
 0x214   :  { %525 = vmatmul.msk.bf16.gmra.mxu1 %vm199_vm0, %v557_v9 }
 0x281   :  { %v354_v12 = vpop.f32.mrf.mxu1 }
 0x282   :  { %v390_v13 = vadd.f32 %v389_v10, %v354_v12 }
 0x284   :  { %v424_v14 = vadd.f32 %v407_v11, %v390_v13 }
 0x286   :  { %v428_v16 = vmax.f32 %v424_v14, 0.0 }
 0x288   :  { %432 = vst [vmem:[#allocation8] sm:$0xff] %v428_v16 }
 0x289   :  { %v356_v17 = vpop.f32.mrf.mxu1 }
 0x28a   :  { %v392_v19 = vadd.f32 %v391_v15, %v356_v17 }
 0x28c   :  { %v425_v20 = vadd.f32 %v412_v18, %v392_v19 }
 0x28e   :  { %v429_v21 = vmax.f32 %v425_v20, 0.0 }
 0x290   :  { %433 = vst [vmem:[#allocation8 + $0x8] sm:$0xff] %v429_v21 }
 0x291   :  { %v359_v23 = vpop.f32.mrf.mxu1 }
 0x292   :  { %v395_v24 = vadd.f32 %v394_v22, %v359_v23 }
 0x294   :  { %v426_v26 = vadd.f32 %v417_v25, %v395_v24 }
 0x296   :  { %v430_v27 = vmax.f32 %v426_v26, 0.0 }
 0x298   :  { %434 = vst [vmem:[#allocation8 + $0x10] sm:$0xff] %v430_v27 }
 0x299   :  { %v361_v28 = vpop.f32.mrf.mxu1 }
 0x29a   :  { %v397_v30 = vadd.f32 %v396_v29, %v361_v28 }
 0x29c   :  { %v427_v32 = vadd.f32 %v422_v31, %v397_v30 }
 0x29e   :  { %v431_v33 = vmax.f32 %v427_v32, 0.0 }
 0x2a0   :  { %435 = vst [vmem:[#allocation8 + $0x18] sm:$0xff] %v431_v33 }
 0x2a1   :  { %448 = dma.vmem_to_hbm [thread:$0]  %s441_s16, 512, %s443_s19, [#allocation4], %s680_s20, %s680_s20, %s681_s21  }
 0x2a2   :  { %671 = dma.done.wait [#allocation4], 512  }
 0x2a3   :  { %672 = vsyncadd [#allocation4], 4294966784 }
 0x2a4   :  { %453 = vsyncpa [#allocation3], 1 }
 0x2a5   :  { %454 = vsyncpa [#allocation6], 1 }
 0x2a6   :  { %455 = vsyncpa [#allocation4], 1 }

</bundles_post_ra>
